<compile_context>
chip_gen: v6e
topology: v6e:2x2x1
jax: 0.10.0
libtpu: 0.0.40
codegen_flags: <defaults>
</compile_context>

<pallas_src>
import functools

import jax
import jax.numpy as jnp
from jax.experimental import pallas as pl
from jax.experimental.pallas import tpu as pltpu


def _round_up(x, m):
    return ((x + m - 1) // m) * m


def _cdiv(a, b):
    return (a + b - 1) // b


def _vmem_limit_bytes():
    """Generation-aware scoped-VMEM budget (48 MiB on v7x, 64 MiB elsewhere)."""
    try:
        phys = pltpu.get_tpu_info().vmem_capacity_bytes
    except Exception:  # pragma: no cover - conservative default (v7x-sized)
        phys = 64 * 1024 * 1024
    return min(64 * 1024 * 1024, max(32 * 1024 * 1024, (phys * 3) // 4))


def _pick_tile(dim, cap):
    """Tile for a lane dim that must be tiled (dim > cap).

    Minimizes padding waste first, then prefers 256-multiples (v6e/v7x MXU
    width), then larger tiles.  Returns (tile, padded_dim)."""
    aligned = _round_up(dim, 128)
    best_key, best_t = None, 128
    for c in (1024, 768, 512, 384, 256, 128):
        if c > cap:
            continue
        waste = _round_up(aligned, c) - aligned
        key = (waste, 0 if c % 256 == 0 else 1, -c)
        if best_key is None or key < best_key:
            best_key, best_t = key, c
    return best_t, _round_up(aligned, best_t)


def _linear_kernel_f32(x_ref, w_ref, b_ref, o_ref):
    """f32 output: accumulate straight into the resident output block."""
    k = pl.program_id(2)

    @pl.when(k == 0)
    def _():
        o_ref[...] = jnp.zeros_like(o_ref)

    o_ref[...] += jnp.dot(
        x_ref[...], w_ref[...], preferred_element_type=jnp.float32
    )

    @pl.when(k == pl.num_programs(2) - 1)
    def _():
        o_ref[...] += b_ref[...].astype(jnp.float32)


def _linear_kernel_acc(x_ref, w_ref, b_ref, o_ref, acc_ref):
    """Non-f32 output: f32 scratch accumulator, cast once in finalize."""
    k = pl.program_id(2)

    @pl.when(k == 0)
    def _():
        acc_ref[...] = jnp.zeros_like(acc_ref)

    acc_ref[...] += jnp.dot(
        x_ref[...], w_ref[...], preferred_element_type=jnp.float32
    )

    @pl.when(k == pl.num_programs(2) - 1)
    def _():
        o_ref[...] = (acc_ref[...] + b_ref[...].astype(jnp.float32)).astype(
            o_ref.dtype
        )


@functools.partial(jax.jit, static_argnames=("force_pallas",))
def single_node_xavier_forward(x, weight, bias=None, *, force_pallas=False):
    """y = x @ weight + bias (matches the PyTorch module's forward)."""
    in_ft, out_ft = weight.shape
    orig_shape = x.shape
    x2d = x.reshape(-1, in_ft)
    m = x2d.shape[0]

    if bias is None:
        bias = jnp.zeros((out_ft,), dtype=weight.dtype)

    # Tiny-problem fallback: grid/DMA/pad overhead dominates; let XLA fuse it.
    if not force_pallas and m * in_ft * out_ft < (1 << 18):
        out2d = x2d @ weight + bias
        return out2d.reshape(*orig_shape[:-1], out_ft)

    out_dtype = jnp.result_type(x.dtype, weight.dtype)

    # --- tile selection (all shapes static at trace time) -------------------
    itemsize = jnp.dtype(x.dtype).itemsize
    sublane = {4: 8, 2: 16, 1: 32}.get(itemsize, 8)
    CAP_M, CAP_N, CAP_K = 1024, 1024, 512

    if m <= CAP_M:
        tm, m_pad = m, m                       # full dim -> no pad needed
    else:
        nt = _cdiv(m, CAP_M)
        tm = _round_up(_cdiv(m, nt), sublane)  # waste < sublane per tile
        m_pad = _round_up(m, tm)

    if in_ft <= CAP_K:
        tk, k_pad = in_ft, in_ft
    else:
        tk, k_pad = _pick_tile(in_ft, CAP_K)

    if out_ft <= CAP_N:
        tn, n_pad = out_ft, out_ft
    else:
        tn, n_pad = _pick_tile(out_ft, CAP_N)

    # Megacore: make sure there are >= 2 parallel grid steps when possible so
    # both v7x TensorCores get work for small-M shapes.
    if (m_pad // tm) == 1 and (n_pad // tn) == 1 and tn % 256 == 0:
        tn //= 2

    # --- zero padding only where actually required ---------------------------
    if m_pad == m and k_pad == in_ft:
        x_p = x2d
    else:
        x_p = jnp.pad(x2d, ((0, m_pad - m), (0, k_pad - in_ft)))
    if k_pad == in_ft and n_pad == out_ft:
        w_p = weight
    else:
        w_p = jnp.pad(weight, ((0, k_pad - in_ft), (0, n_pad - out_ft)))
    b2d = bias.reshape(1, out_ft)
    b_p = b2d if n_pad == out_ft else jnp.pad(b2d, ((0, 0), (0, n_pad - out_ft)))

    use_direct = out_dtype == jnp.float32
    kernel = _linear_kernel_f32 if use_direct else _linear_kernel_acc
    scratch = [] if use_direct else [pltpu.VMEM((tm, tn), jnp.float32)]

    cost = pl.CostEstimate(
        flops=2 * m_pad * k_pad * n_pad,
        transcendentals=0,
        bytes_accessed=(
            (n_pad // tn) * m_pad * k_pad          # x re-streamed per j tile
            + (m_pad // tm) * k_pad * n_pad        # W re-streamed per i tile
            + n_pad
            + m_pad * n_pad
        ) * itemsize,
    )

    out_padded = pl.pallas_call(
        kernel,
        out_shape=jax.ShapeDtypeStruct((m_pad, n_pad), out_dtype),
        grid_spec=pltpu.PrefetchScalarGridSpec(
            num_scalar_prefetch=0,
            grid=(m_pad // tm, n_pad // tn, k_pad // tk),
            in_specs=[
                pl.BlockSpec((tm, tk), lambda i, j, k: (i, k)),   # x tile
                pl.BlockSpec((tk, tn), lambda i, j, k: (k, j)),   # W tile
                pl.BlockSpec((1, tn), lambda i, j, k: (0, j)),    # bias tile
            ],
            out_specs=pl.BlockSpec((tm, tn), lambda i, j, k: (i, j)),
            scratch_shapes=scratch,
        ),
        compiler_params=pltpu.CompilerParams(
            dimension_semantics=("parallel", "parallel", "arbitrary"),
            vmem_limit_bytes=_vmem_limit_bytes(),
        ),
        cost_estimate=cost,
    )(x_p, w_p, b_p)

    if m_pad == m and n_pad == out_ft:
        out2d = out_padded
    else:
        out2d = out_padded[:m, :out_ft]
    return out2d.reshape(*orig_shape[:-1], out_ft)


def init_params(key, in_ft, out_ft, dtype=jnp.float32):
    """Xavier-uniform weight + zero bias (mirrors reset_parameters)."""
    bound = (6.0 / (in_ft + out_ft)) ** 0.5
    weight = jax.random.uniform(
        key, (in_ft, out_ft), dtype=dtype, minval=-bound, maxval=bound
    )
    bias = jnp.zeros((out_ft,), dtype=dtype)
    return weight, bias


if __name__ == "__main__":
    key = jax.random.PRNGKey(0)
    k_x, k_w, k_x2 = jax.random.split(key, 3)

    # Small shapes consistent with the module: seq=8 nodes, in_ft=32, out_ft=32.
    seq, in_ft, out_ft = 8, 32, 32
    x = jax.random.normal(k_x, (seq, in_ft), dtype=jnp.float32)
    weight, bias = init_params(k_w, in_ft, out_ft)

    # Force the Pallas path even at this tiny size so the kernel itself runs.
    y = single_node_xavier_forward(x, weight, bias, force_pallas=True)
    jax.block_until_ready(y)
    y_ref = x @ weight + bias
    assert y.shape == (seq, out_ft)
    assert jnp.allclose(y, y_ref, atol=1e-5, rtol=1e-5)

    # Batched input with a non-aligned row count; default dispatch exercises
    # the small-problem fallback path.
    x2 = jax.random.normal(k_x2, (3, 5, in_ft), dtype=jnp.float32)
    y2 = single_node_xavier_forward(x2, weight, bias)
    jax.block_until_ready(y2)
    y2_ref = x2 @ weight + bias
    assert y2.shape == (3, 5, out_ft)
    assert jnp.allclose(y2, y2_ref, atol=1e-5, rtol=1e-5)

    print("KERNEL_OK")
</pallas_src>

<mosaic_0001>
module attributes {stable_mosaic.version = 11 : i64} {
  func.func @_linear_kernel_f32(%arg0: i32, %arg1: i32, %arg2: i32, %arg3: memref<8x32xf32, #tpu.memory_space<vmem>>, %arg4: memref<32x32xf32, #tpu.memory_space<vmem>>, %arg5: memref<1x32xf32, #tpu.memory_space<vmem>>, %arg6: memref<8x32xf32, #tpu.memory_space<vmem>>) attributes {dimension_semantics = [#tpu.dimension_semantics<parallel>, #tpu.dimension_semantics<parallel>, #tpu.dimension_semantics<arbitrary>], iteration_bounds = array<i64: 1, 1, 1>, scalar_prefetch = 0 : i64, scratch_operands = 0 : i64, tpu.core_type = #tpu.core_type<tc>, window_params = [{transform_indices = @transform_0, window_bounds = array<i64: 8, 32>}, {transform_indices = @transform_1, window_bounds = array<i64: 32, 32>}, {transform_indices = @transform_2, window_bounds = array<i64: 1, 32>}, {transform_indices = @transform_3, window_bounds = array<i64: 8, 32>}]} {
    %c0_i32 = arith.constant 0 : i32
    %0 = arith.cmpi eq, %arg2, %c0_i32 : i32
    %1 = arith.extui %0 : i1 to i32
    %c0_i32_0 = arith.constant 0 : i32
    %2 = arith.cmpi ne, %1, %c0_i32_0 : i32
    scf.if %2 {
      %cst_10 = arith.constant 0.000000e+00 : f32
      %12 = vector.broadcast %cst_10 : f32 to vector<8x32xf32>
      %c0_11 = arith.constant 0 : index
      %c0_12 = arith.constant 0 : index
      %13 = vector.load %arg6[%c0_11, %c0_12] : memref<8x32xf32, #tpu.memory_space<vmem>>, vector<8x32xf32>
      tpu.vector_store %arg6[%c0_11, %c0_12], %12 {strides = array<i32>} : memref<8x32xf32, #tpu.memory_space<vmem>>, vector<8x32xf32>,
    } else {
    }
    %c0 = arith.constant 0 : index
    %c0_1 = arith.constant 0 : index
    %3 = vector.load %arg6[%c0, %c0_1] : memref<8x32xf32, #tpu.memory_space<vmem>>, vector<8x32xf32>
    %c0_2 = arith.constant 0 : index
    %c0_3 = arith.constant 0 : index
    %4 = vector.load %arg3[%c0_2, %c0_3] : memref<8x32xf32, #tpu.memory_space<vmem>>, vector<8x32xf32>
    %c0_4 = arith.constant 0 : index
    %c0_5 = arith.constant 0 : index
    %5 = vector.load %arg4[%c0_4, %c0_5] : memref<32x32xf32, #tpu.memory_space<vmem>>, vector<32x32xf32>
    %cst = arith.constant dense<0.000000e+00> : vector<8x32xf32>
    %6 = tpu.matmul %4, %5, %cst {dimension_numbers = #tpu.dot_dimension_numbers<[1], [0], [0], [1], [0, 0, 1, 1], [], []>} : vector<8x32xf32>, vector<32x32xf32>, vector<8x32xf32> -> vector<8x32xf32>
    %7 = arith.addf %3, %6 : vector<8x32xf32>
    %c0_6 = arith.constant 0 : index
    %c0_7 = arith.constant 0 : index
    %8 = vector.load %arg6[%c0_6, %c0_7] : memref<8x32xf32, #tpu.memory_space<vmem>>, vector<8x32xf32>
    tpu.vector_store %arg6[%c0_6, %c0_7], %7 {strides = array<i32>} : memref<8x32xf32, #tpu.memory_space<vmem>>, vector<8x32xf32>,
    %c0_i32_8 = arith.constant 0 : i32
    %9 = arith.cmpi eq, %arg2, %c0_i32_8 : i32
    %10 = arith.extui %9 : i1 to i32
    %c0_i32_9 = arith.constant 0 : i32
    %11 = arith.cmpi ne, %10, %c0_i32_9 : i32
    scf.if %11 {
      %c0_10 = arith.constant 0 : index
      %c0_11 = arith.constant 0 : index
      %12 = vector.load %arg6[%c0_10, %c0_11] : memref<8x32xf32, #tpu.memory_space<vmem>>, vector<8x32xf32>
      %c0_12 = arith.constant 0 : index
      %c0_13 = arith.constant 0 : index
      %13 = vector.load %arg5[%c0_12, %c0_13] : memref<1x32xf32, #tpu.memory_space<vmem>>, vector<1x32xf32>
      %14 = vector.broadcast %13 : vector<1x32xf32> to vector<8x32xf32>
      %15 = arith.addf %12, %14 : vector<8x32xf32>
      %c0_14 = arith.constant 0 : index
      %c0_15 = arith.constant 0 : index
      %16 = vector.load %arg6[%c0_14, %c0_15] : memref<8x32xf32, #tpu.memory_space<vmem>>, vector<8x32xf32>
      tpu.vector_store %arg6[%c0_14, %c0_15], %15 {strides = array<i32>} : memref<8x32xf32, #tpu.memory_space<vmem>>, vector<8x32xf32>,
    } else {
    }
    return
  }
  func.func @transform_0(%arg0: i32, %arg1: i32, %arg2: i32) -> (i32, i32) {
    %c0_i32 = arith.constant 0 : i32
    return %arg0, %arg2 : i32, i32
  }
  func.func @transform_1(%arg0: i32, %arg1: i32, %arg2: i32) -> (i32, i32) {
    %c0_i32 = arith.constant 0 : i32
    return %arg2, %arg1 : i32, i32
  }
  func.func @transform_2(%arg0: i32, %arg1: i32, %arg2: i32) -> (i32, i32) {
    %c0_i32 = arith.constant 0 : i32
    %c0_i32_0 = arith.constant 0 : i32
    return %c0_i32, %arg1 : i32, i32
  }
  func.func @transform_3(%arg0: i32, %arg1: i32, %arg2: i32) -> (i32, i32) {
    %c0_i32 = arith.constant 0 : i32
    return %arg0, %arg1 : i32, i32
  }
}

</mosaic_0001>

<bundles_post_ra>
// kernel: single_node_xavier_forward.1
= control target key start
LH: loop header
LB: loop body
LE: loop exit
PB: predicated region body
PF: predicated region fallthrough
CT: control target
= control target key end

     0   :  { %8 = vsyncpa [#allocation3], 0  ;;  %s292_s0 = inlined_call_operand.hbm [shape: f32[8,32], index: 0, kind: input, shape index: {}]   ;;  %s293_s1 = inlined_call_operand.hbm [shape: f32[32,32], index: 1, kind: input, shape index: {}]   ;;  %s294_s2 = inlined_call_operand.vmem [shape: f32[1,32], index: 2, kind: input, shape index: {}]   ;;  %s295_s3 = inlined_call_operand.hbm [shape: f32[8,32], index: 3, kind: output, shape index: {}]  }
   0x1   :  { %9 = vsyncpa [#allocation6], 0 }
   0x2   :  { %10 = vsyncpa [#allocation4], 0  ;;  %s249_s12 = smov [#allocation2]   ;;  %s250_s14 = smov [#allocation5]  }
   0x3   :  { %s17_s13 = sshll.u32 %s249_s12, 4  ;;  %s26_s15 = sshll.u32 %s250_s14, 4  ;;  %s18_s13 = int_to_ptr.vmem [resolvable:$true] %s17_s13  ;;  %s27_s15 = int_to_ptr.vmem [resolvable:$true] %s26_s15 }
   0x4   :  { %s191_s16 = scalar_lea.vmem %s18_s13, 128  ;;  %p196_p1 = scmp.lt.s32.totalorder %s18_s13, %s18_s13 }
   0x5   :  { %p192_p0 = scmp.ne.s32.totalorder %s18_s13, %s191_s16  ;;  %p197_p2 = scmp.lt.s32.totalorder %s191_s16, %s191_s16 }
   0x7   :  { %p198_p3 = por %p197_p2, %p196_p1 }
   0x9   :  { %p199_p4 = pnand %p198_p3, %p192_p0 }
   0xb   :  { %202 = shalt.err (!%p199_p4)
}
   0xc   :  { %20 = dma.hbm_to_vmem [thread:$0]  %s292_s0, 128, %s18_s13, [#allocation3]  }
   0xd   :  { %s211_s19 = scalar_lea.vmem %s27_s15, 512  ;;  %p216_p6 = scmp.lt.s32.totalorder %s27_s15, %s27_s15 }
   0xe   :  { %p212_p5 = scmp.ne.s32.totalorder %s27_s15, %s211_s19  ;;  %p217_p7 = scmp.lt.s32.totalorder %s211_s19, %s211_s19 }
  0x10   :  { %p218_p8 = por %p217_p7, %p216_p6 }
  0x12   :  { %p219_p9 = pnand %p218_p8, %p212_p5 }
  0x14   :  { %222 = shalt.err (!%p219_p9)
}
  0x15   :  { %s251_s20 = smov 128   ;;  %s252_s21 = smov 8  }
  0x16   :  { %32 = dma.hbm_to_vmem [thread:$0]  %s293_s1, 512, %s27_s15, [#allocation6], %s251_s20, %s251_s20, %s252_s21  }
  0x17   :  { %243 = dma.done.wait [#allocation3], 128  }
  0x18   :  { %244 = vsyncadd [#allocation3], 4294967168 }
  0x19   :  { %245 = dma.done.wait [#allocation6], 512  }
  0x1a   :  { %246 = vsyncadd [#allocation6], 4294966784  ;;  %vm45_vm0 = vcmask 261120   ;;  %v253_v0 = vmov 0.0   ;;  %vm254_vm1 = vmmov 0   ;;  %v52_v1 = vld [vmem:[#allocation5 + $0x18] sm:$0xff] }
  0x1b   :  { %165 = vmatprep.subr.mxu0 %v253_v0  ;;  %173 = vmatprep.mubr.msk.f32.mxu0 %vm254_vm1, %v253_v0  ;;  %46 = vst.msk [vmem:[#allocation7] sm:$0xff] %vm45_vm0, %v253_v0  ;;  %v51_v2 = vld [vmem:[#allocation5 + $0x10] sm:$0xff]  ;;  %v50_v3 = vld [vmem:[#allocation5 + $0x8] sm:$0xff]  ;;  %v49_v4 = vld [vmem:[#allocation5] sm:$0xff]  ;;  %s255_s24 = smov [#allocation7]  }
  0x1c   :  { %166 = vmatpush3.msra.mxu0 %v52_v1  ;;  %v48_v5 = vld [vmem:[#allocation2] sm:$0xff]  ;;  %s148_s25 = sshll.u32 %s255_s24, 4  ;;  %s149_s25 = int_to_ptr.vmem [resolvable:$true] %s148_s25 }
  0x1d   :  { %167 = vmatprep.subr.mxu0 %v253_v0  ;;  %v159_v10 = vld [vmem:[%s294_s2] ss:$0 sm:$0xff]  ;;  %s223_s26 = scalar_lea.vmem %s149_s25, 128  ;;  %p228_p11 = scmp.lt.s32.totalorder %s149_s25, %s149_s25 }
  0x1e   :  { %168 = vmatpush3.msra.mxu0 %v51_v2  ;;  %p224_p10 = scmp.ne.s32.totalorder %s149_s25, %s223_s26  ;;  %p229_p12 = scmp.lt.s32.totalorder %s223_s26, %s223_s26 }
  0x1f   :  { %169 = vmatprep.subr.mxu0 %v253_v0 }
  0x20   :  { %170 = vmatpush3.msra.mxu0 %v50_v3  ;;  %p230_p13 = por %p229_p12, %p228_p11 }
  0x21   :  { %171 = vmatprep.subr.mxu0 %v253_v0 }
  0x22   :  { %172 = vmatpush3.msra.mxu0 %v49_v4  ;;  %v47_v6 = vld [vmem:[#allocation7] sm:$0xff]  ;;  %p231_p0 = pnand %p230_p13, %p224_p10 }
  0x23   :  { %174 = vmatmul.mubr.msk.f32.vlgmr.msra.gmra.mxu0 %vm45_vm0, %v48_v5 }
  0xe3   :  { %v123_v7 = vpop.f32.mrf.mxu0 }
  0xe4   :  { %v127_v8 = vadd.f32 %v123_v7, %v47_v6 }
  0xe5   :  { %v175_v9 = vpop.f32.mrf.mxu0 }
  0xe6   :  { %128 = vst.msk [vmem:[#allocation7] sm:$0xff] %vm45_vm0, %v127_v8 }
  0xed   :  { %v132_v11 = vld [vmem:[#allocation7] sm:$0xff] }
  0xee   :  { %v140_v12 = vadd.f32 %v159_v10, %v132_v11 }
  0xf0   :  { %141 = vst.msk [vmem:[#allocation7] sm:$0xff] %vm45_vm0, %v140_v12 }
  0xf1   :  { %234 = shalt.err (!%p231_p0)
}
  0xf2   :  { %151 = dma.vmem_to_hbm [thread:$0]  %s149_s25, 128, %s295_s3, [#allocation4]  }
  0xf3   :  { %247 = dma.done.wait [#allocation4], 128  }
  0xf4   :  { %248 = vsyncadd [#allocation4], 4294967168 }
  0xf5   :  { %155 = vsyncpa [#allocation3], 1 }
  0xf6   :  { %156 = vsyncpa [#allocation6], 1 }
  0xf7   :  { %157 = vsyncpa [#allocation4], 1 }

</bundles_post_ra>
